<compile_context>
chip_gen: v7x
topology: tpu7x:2x2x1
jax: 0.10.0
libtpu: 0.0.40
codegen_flags: <defaults>
</compile_context>

<pallas_src>
import functools

import jax
import jax.numpy as jnp
from jax.experimental import pallas as pl
from jax.experimental.pallas import tpu as pltpu

_LANE = 128                       # lane width: pad feature/hidden dims to this
_SUBLANE = 8                      # sublane width: pad node dim to this (fused)
_VMEM_LIMIT = 32 * 1024 * 1024    # safe on v5e/v6e (128 MiB) and v7x (64 MiB)


def _round_up(v, m):
    return (v + m - 1) // m * m


def _pad2d(a, rows, cols):
    r, c = a.shape
    return jnp.pad(a, ((0, rows - r), (0, cols - c)))


# ---------------------------------------------------------------------------
# Fused small-graph kernel: both SAGEConv layers in one pallas_call.
# ---------------------------------------------------------------------------
def _fused_sage_kernel(a_ref, x_ref, wl1_ref, wr1_ref, b1_ref,
                       wl2_ref, wr2_ref, b2_ref, o_ref):
    a = a_ref[...]                        # [Np, Np]  bf16
    x = x_ref[...]                        # [Np, Fp]  bf16

    # layer 1: relu((A @ x) @ W_l1 + x @ W_r1 + b1)
    agg1 = jnp.dot(a, x, preferred_element_type=jnp.float32)
    h1 = jnp.dot(agg1.astype(jnp.bfloat16), wl1_ref[...],
                 preferred_element_type=jnp.float32)
    h1 = h1 + jnp.dot(x, wr1_ref[...], preferred_element_type=jnp.float32)
    h1 = jnp.maximum(h1 + b1_ref[...], 0.0)
    h1b = h1.astype(jnp.bfloat16)         # stays on-chip, no HBM round-trip

    # layer 2: (A @ h1) @ W_l2 + h1 @ W_r2 + b2
    agg2 = jnp.dot(a, h1b, preferred_element_type=jnp.float32)
    out = jnp.dot(agg2.astype(jnp.bfloat16), wl2_ref[...],
                  preferred_element_type=jnp.float32)
    out = out + jnp.dot(h1b, wr2_ref[...], preferred_element_type=jnp.float32)
    out = out + b2_ref[...]
    o_ref[...] = out.astype(o_ref.dtype)


def _graph_sage_fused(a_bf16, x_bf16, p):
    np_, fp = x_bf16.shape
    hp = p["w_l1"].shape[1]
    flops = (2 * np_ * np_ * fp + 4 * np_ * fp * hp
             + 2 * np_ * np_ * hp + 4 * np_ * hp * hp)
    bytes_accessed = (a_bf16.size * 2 + x_bf16.size * 2
                      + 2 * (fp * hp + hp * hp) * 2 + 2 * hp * 4
                      + np_ * hp * 4)

    def full(shape):
        return pl.BlockSpec(shape, lambda i: (0, 0))

    return pl.pallas_call(
        _fused_sage_kernel,
        out_shape=jax.ShapeDtypeStruct((np_, hp), jnp.float32),
        grid=(1,),
        in_specs=[
            full((np_, np_)),     # A_norm
            full((np_, fp)),      # x
            full((fp, hp)),       # W_l1
            full((fp, hp)),       # W_r1
            full((1, hp)),        # b1
            full((hp, hp)),       # W_l2
            full((hp, hp)),       # W_r2
            full((1, hp)),        # b2
        ],
        out_specs=full((np_, hp)),
        compiler_params=pltpu.CompilerParams(
            dimension_semantics=("arbitrary",),
            vmem_limit_bytes=_VMEM_LIMIT,
        ),
        cost_estimate=pl.CostEstimate(
            flops=flops, transcendentals=0, bytes_accessed=bytes_accessed),
    )(a_bf16, x_bf16, p["w_l1"], p["w_r1"], p["b1"],
      p["w_l2"], p["w_r2"], p["b2"])


# ---------------------------------------------------------------------------
# Tiled per-layer kernel: grid = (dst-row tiles, aggregation-K tiles).
# ---------------------------------------------------------------------------
def _sage_layer_tiled_kernel(a_ref, xk_ref, xi_ref, wl_ref, wr_ref, b_ref,
                             o_ref, acc_ref, *, apply_relu):
    k = pl.program_id(1)

    @pl.when(k == 0)
    def _():
        acc_ref[...] = jnp.zeros_like(acc_ref)

    # Accumulate mean-aggregated neighbor features for this row tile (f32).
    acc_ref[...] += jnp.dot(a_ref[...], xk_ref[...],
                            preferred_element_type=jnp.float32)

    @pl.when(k == pl.num_programs(1) - 1)
    def _():
        # Epilogue (once per row tile): projections + hoisted self term + bias.
        out = jnp.dot(acc_ref[...].astype(jnp.bfloat16), wl_ref[...],
                      preferred_element_type=jnp.float32)
        out = out + jnp.dot(xi_ref[...], wr_ref[...],
                            preferred_element_type=jnp.float32)
        out = out + b_ref[...]
        if apply_relu:
            out = jnp.maximum(out, 0.0)
        o_ref[...] = out.astype(o_ref.dtype)


def _sage_conv_tiled(a_bf16, x_bf16, w_l, w_r, b, *, apply_relu, tile=128):
    np_ = a_bf16.shape[0]
    fp = x_bf16.shape[1]
    hp = w_l.shape[1]
    assert np_ % tile == 0
    grid = (np_ // tile, np_ // tile)
    kernel = functools.partial(_sage_layer_tiled_kernel, apply_relu=apply_relu)
    flops = 2 * np_ * np_ * fp + 4 * np_ * fp * hp
    bytes_accessed = (np_ * np_ * 2 + 2 * np_ * fp * 2 + 2 * fp * hp * 2
                      + hp * 4 + np_ * hp * 4)
    return pl.pallas_call(
        kernel,
        out_shape=jax.ShapeDtypeStruct((np_, hp), jnp.float32),
        grid=grid,
        in_specs=[
            pl.BlockSpec((tile, tile), lambda i, k: (i, k)),  # A_norm tile
            pl.BlockSpec((tile, fp), lambda i, k: (k, 0)),    # x rows (agg, K)
            pl.BlockSpec((tile, fp), lambda i, k: (i, 0)),    # x rows (self)
            pl.BlockSpec((fp, hp), lambda i, k: (0, 0)),      # W_l
            pl.BlockSpec((fp, hp), lambda i, k: (0, 0)),      # W_r
            pl.BlockSpec((1, hp), lambda i, k: (0, 0)),       # bias
        ],
        out_specs=pl.BlockSpec((tile, hp), lambda i, k: (i, 0)),
        scratch_shapes=[pltpu.VMEM((tile, fp), jnp.float32)],
        compiler_params=pltpu.CompilerParams(
            dimension_semantics=("parallel", "arbitrary"),
            vmem_limit_bytes=_VMEM_LIMIT,
        ),
        cost_estimate=pl.CostEstimate(
            flops=flops, transcendentals=0, bytes_accessed=bytes_accessed),
    )(a_bf16, x_bf16, x_bf16, w_l, w_r, b)


# ---------------------------------------------------------------------------
# Glue: adjacency build, parameter padding, forward pass.
# ---------------------------------------------------------------------------
def build_mean_adjacency(edge_index, n_pad):
    """Dense row-normalized adjacency A[dst, src] = count / in_degree(dst)."""
    src, dst = edge_index[0], edge_index[1]
    a = jnp.zeros((n_pad, n_pad), jnp.float32).at[dst, src].add(1.0)
    deg = a.sum(axis=1, keepdims=True)
    return a / jnp.maximum(deg, 1.0)


def _pad_params(params, f_pad, h_pad):
    return {
        "w_l1": _pad2d(params["w_l1"], f_pad, h_pad).astype(jnp.bfloat16),
        "w_r1": _pad2d(params["w_r1"], f_pad, h_pad).astype(jnp.bfloat16),
        "b1": _pad2d(params["b1"], 1, h_pad),
        "w_l2": _pad2d(params["w_l2"], h_pad, h_pad).astype(jnp.bfloat16),
        "w_r2": _pad2d(params["w_r2"], h_pad, h_pad).astype(jnp.bfloat16),
        "b2": _pad2d(params["b2"], 1, h_pad),
    }


def graph_sage_forward(x, edge_index, params, *, tile=128, fused_max_nodes=512):
    """Two SAGEConv(mean) layers with ReLU in between (PyG GraphSAGE.forward)."""
    n, f_in = x.shape
    h = params["w_l1"].shape[1]
    f_pad = _round_up(f_in, _LANE)
    h_pad = _round_up(h, _LANE)

    if n <= fused_max_nodes:
        # Small graph: everything fits comfortably in VMEM -> one fused kernel.
        n_pad = _round_up(n, _SUBLANE)
        a = build_mean_adjacency(edge_index, n_pad).astype(jnp.bfloat16)
        xp = _pad2d(x, n_pad, f_pad).astype(jnp.bfloat16)
        pp = _pad_params(params, f_pad, h_pad)
        out = _graph_sage_fused(a, xp, pp)
    else:
        # Large graph: tiled, pipelined per-layer kernels.
        n_pad = _round_up(n, tile)
        a = build_mean_adjacency(edge_index, n_pad).astype(jnp.bfloat16)
        xp = _pad2d(x, n_pad, f_pad).astype(jnp.bfloat16)
        pp = _pad_params(params, f_pad, h_pad)
        h1 = _sage_conv_tiled(a, xp, pp["w_l1"], pp["w_r1"], pp["b1"],
                              apply_relu=True, tile=tile)
        out = _sage_conv_tiled(a, h1.astype(jnp.bfloat16),
                               pp["w_l2"], pp["w_r2"], pp["b2"],
                               apply_relu=False, tile=tile)
    return out[:n, :h]


def graph_sage_reference(x, edge_index, params):
    """Pure-JAX f32 reference (PyG SAGEConv: mean aggr, root weight, bias)."""
    n = x.shape[0]
    a = build_mean_adjacency(edge_index, n)
    h1 = jnp.maximum(
        (a @ x) @ params["w_l1"] + x @ params["w_r1"] + params["b1"], 0.0)
    return (a @ h1) @ params["w_l2"] + h1 @ params["w_r2"] + params["b2"]


def init_params(key, f_in, hidden):
    ks = jax.random.split(key, 4)

    def glorot(k, shape):
        limit = jnp.sqrt(6.0 / (shape[0] + shape[1]))
        return jax.random.uniform(k, shape, jnp.float32, -limit, limit)

    return {
        "w_l1": glorot(ks[0], (f_in, hidden)),
        "w_r1": glorot(ks[1], (f_in, hidden)),
        "b1": jnp.zeros((1, hidden), jnp.float32),
        "w_l2": glorot(ks[2], (hidden, hidden)),
        "w_r2": glorot(ks[3], (hidden, hidden)),
        "b2": jnp.zeros((1, hidden), jnp.float32),
    }


if __name__ == "__main__":
    key = jax.random.PRNGKey(0)

    # --- toy size implied by the module's test fixture: fused kernel path ---
    N, F_IN, HIDDEN, E = 64, 16, 32, 256
    k_x, k_src, k_dst, k_par, key = jax.random.split(key, 5)
    x = jax.random.normal(k_x, (N, F_IN), jnp.float32)
    src = jax.random.randint(k_src, (E,), 0, N, dtype=jnp.int32)
    dst = jax.random.randint(k_dst, (E,), 0, N, dtype=jnp.int32)
    edge_index = jnp.stack([src, dst], axis=0)          # [2, E]
    params = init_params(k_par, F_IN, HIDDEN)

    out = graph_sage_forward(x, edge_index, params)
    jax.block_until_ready(out)
    assert out.shape == (N, HIDDEN) and out.dtype == jnp.float32
    ref = graph_sage_reference(x, edge_index, params)
    assert jnp.allclose(out, ref, rtol=5e-2, atol=1e-1), (
        "fused max abs err %f" % float(jnp.max(jnp.abs(out - ref))))

    # --- larger graph: exercises the tiled / pipelined kernel path ---
    N2, E2 = 256, 2048
    k_x2, k_s2, k_d2, key = jax.random.split(key, 4)
    x2 = jax.random.normal(k_x2, (N2, F_IN), jnp.float32)
    edge_index2 = jnp.stack([
        jax.random.randint(k_s2, (E2,), 0, N2, dtype=jnp.int32),
        jax.random.randint(k_d2, (E2,), 0, N2, dtype=jnp.int32)], axis=0)
    out2 = graph_sage_forward(x2, edge_index2, params, fused_max_nodes=0)
    jax.block_until_ready(out2)
    assert out2.shape == (N2, HIDDEN) and out2.dtype == jnp.float32
    ref2 = graph_sage_reference(x2, edge_index2, params)
    assert jnp.allclose(out2, ref2, rtol=5e-2, atol=1e-1), (
        "tiled max abs err %f" % float(jnp.max(jnp.abs(out2 - ref2))))

    print("KERNEL_OK")
</pallas_src>

<mosaic_0001>
module attributes {stable_mosaic.version = 11 : i64} {
  func.func @_fused_sage_kernel(%arg0: i32, %arg1: memref<64x64xbf16, #tpu.memory_space<vmem>>, %arg2: memref<64x128xbf16, #tpu.memory_space<vmem>>, %arg3: memref<128x128xbf16, #tpu.memory_space<vmem>>, %arg4: memref<128x128xbf16, #tpu.memory_space<vmem>>, %arg5: memref<1x128xf32, #tpu.memory_space<vmem>>, %arg6: memref<128x128xbf16, #tpu.memory_space<vmem>>, %arg7: memref<128x128xbf16, #tpu.memory_space<vmem>>, %arg8: memref<1x128xf32, #tpu.memory_space<vmem>>, %arg9: memref<64x128xf32, #tpu.memory_space<vmem>>) attributes {dimension_semantics = [#tpu.dimension_semantics<arbitrary>], iteration_bounds = array<i64: 1>, scalar_prefetch = 0 : i64, scratch_operands = 0 : i64, tpu.core_type = #tpu.core_type<tc>, window_params = [{pipeline_mode = #tpu.pipeline_mode<synchronous>, transform_indices = @transform_0, window_bounds = array<i64: 64, 64>}, {pipeline_mode = #tpu.pipeline_mode<synchronous>, transform_indices = @transform_1, window_bounds = array<i64: 64, 128>}, {pipeline_mode = #tpu.pipeline_mode<synchronous>, transform_indices = @transform_2, window_bounds = array<i64: 128, 128>}, {pipeline_mode = #tpu.pipeline_mode<synchronous>, transform_indices = @transform_3, window_bounds = array<i64: 128, 128>}, {pipeline_mode = #tpu.pipeline_mode<synchronous>, transform_indices = @transform_4, window_bounds = array<i64: 1, 128>}, {pipeline_mode = #tpu.pipeline_mode<synchronous>, transform_indices = @transform_5, window_bounds = array<i64: 128, 128>}, {pipeline_mode = #tpu.pipeline_mode<synchronous>, transform_indices = @transform_6, window_bounds = array<i64: 128, 128>}, {pipeline_mode = #tpu.pipeline_mode<synchronous>, transform_indices = @transform_7, window_bounds = array<i64: 1, 128>}, {pipeline_mode = #tpu.pipeline_mode<synchronous>, transform_indices = @transform_8, window_bounds = array<i64: 64, 128>}]} {
    %c0 = arith.constant 0 : index
    %c0_0 = arith.constant 0 : index
    %0 = vector.load %arg1[%c0, %c0_0] : memref<64x64xbf16, #tpu.memory_space<vmem>>, vector<64x64xbf16>
    %c0_1 = arith.constant 0 : index
    %c0_2 = arith.constant 0 : index
    %1 = vector.load %arg2[%c0_1, %c0_2] : memref<64x128xbf16, #tpu.memory_space<vmem>>, vector<64x128xbf16>
    %cst = arith.constant dense<0.000000e+00> : vector<64x128xf32>
    %2 = tpu.matmul %0, %1, %cst {dimension_numbers = #tpu.dot_dimension_numbers<[1], [0], [0], [1], [0, 0, 1, 1], [], []>} : vector<64x64xbf16>, vector<64x128xbf16>, vector<64x128xf32> -> vector<64x128xf32>
    %3 = arith.truncf %2 : vector<64x128xf32> to vector<64x128xbf16>
    %c0_3 = arith.constant 0 : index
    %c0_4 = arith.constant 0 : index
    %4 = vector.load %arg3[%c0_3, %c0_4] : memref<128x128xbf16, #tpu.memory_space<vmem>>, vector<128x128xbf16>
    %cst_5 = arith.constant dense<0.000000e+00> : vector<64x128xf32>
    %5 = tpu.matmul %3, %4, %cst_5 {dimension_numbers = #tpu.dot_dimension_numbers<[1], [0], [0], [1], [0, 0, 1, 1], [], []>} : vector<64x128xbf16>, vector<128x128xbf16>, vector<64x128xf32> -> vector<64x128xf32>
    %c0_6 = arith.constant 0 : index
    %c0_7 = arith.constant 0 : index
    %6 = vector.load %arg4[%c0_6, %c0_7] : memref<128x128xbf16, #tpu.memory_space<vmem>>, vector<128x128xbf16>
    %cst_8 = arith.constant dense<0.000000e+00> : vector<64x128xf32>
    %7 = tpu.matmul %1, %6, %cst_8 {dimension_numbers = #tpu.dot_dimension_numbers<[1], [0], [0], [1], [0, 0, 1, 1], [], []>} : vector<64x128xbf16>, vector<128x128xbf16>, vector<64x128xf32> -> vector<64x128xf32>
    %8 = arith.addf %5, %7 : vector<64x128xf32>
    %c0_9 = arith.constant 0 : index
    %c0_10 = arith.constant 0 : index
    %9 = vector.load %arg5[%c0_9, %c0_10] : memref<1x128xf32, #tpu.memory_space<vmem>>, vector<1x128xf32>
    %10 = vector.broadcast %9 : vector<1x128xf32> to vector<64x128xf32>
    %11 = arith.addf %8, %10 : vector<64x128xf32>
    %cst_11 = arith.constant 0.000000e+00 : f32
    %12 = vector.broadcast %cst_11 : f32 to vector<64x128xf32>
    %13 = arith.maximumf %11, %12 : vector<64x128xf32>
    %14 = arith.truncf %13 : vector<64x128xf32> to vector<64x128xbf16>
    %cst_12 = arith.constant dense<0.000000e+00> : vector<64x128xf32>
    %15 = tpu.matmul %0, %14, %cst_12 {dimension_numbers = #tpu.dot_dimension_numbers<[1], [0], [0], [1], [0, 0, 1, 1], [], []>} : vector<64x64xbf16>, vector<64x128xbf16>, vector<64x128xf32> -> vector<64x128xf32>
    %16 = arith.truncf %15 : vector<64x128xf32> to vector<64x128xbf16>
    %c0_13 = arith.constant 0 : index
    %c0_14 = arith.constant 0 : index
    %17 = vector.load %arg6[%c0_13, %c0_14] : memref<128x128xbf16, #tpu.memory_space<vmem>>, vector<128x128xbf16>
    %cst_15 = arith.constant dense<0.000000e+00> : vector<64x128xf32>
    %18 = tpu.matmul %16, %17, %cst_15 {dimension_numbers = #tpu.dot_dimension_numbers<[1], [0], [0], [1], [0, 0, 1, 1], [], []>} : vector<64x128xbf16>, vector<128x128xbf16>, vector<64x128xf32> -> vector<64x128xf32>
    %c0_16 = arith.constant 0 : index
    %c0_17 = arith.constant 0 : index
    %19 = vector.load %arg7[%c0_16, %c0_17] : memref<128x128xbf16, #tpu.memory_space<vmem>>, vector<128x128xbf16>
    %cst_18 = arith.constant dense<0.000000e+00> : vector<64x128xf32>
    %20 = tpu.matmul %14, %19, %cst_18 {dimension_numbers = #tpu.dot_dimension_numbers<[1], [0], [0], [1], [0, 0, 1, 1], [], []>} : vector<64x128xbf16>, vector<128x128xbf16>, vector<64x128xf32> -> vector<64x128xf32>
    %21 = arith.addf %18, %20 : vector<64x128xf32>
    %c0_19 = arith.constant 0 : index
    %c0_20 = arith.constant 0 : index
    %22 = vector.load %arg8[%c0_19, %c0_20] : memref<1x128xf32, #tpu.memory_space<vmem>>, vector<1x128xf32>
    %23 = vector.broadcast %22 : vector<1x128xf32> to vector<64x128xf32>
    %24 = arith.addf %21, %23 : vector<64x128xf32>
    %c0_21 = arith.constant 0 : index
    %c0_22 = arith.constant 0 : index
    %25 = vector.load %arg9[%c0_21, %c0_22] : memref<64x128xf32, #tpu.memory_space<vmem>>, vector<64x128xf32>
    tpu.vector_store %arg9[%c0_21, %c0_22], %24 {strides = array<i32>} : memref<64x128xf32, #tpu.memory_space<vmem>>, vector<64x128xf32>,
    return
  }
  func.func @transform_0(%arg0: i32) -> (i32, i32) {
    %c0_i32 = arith.constant 0 : i32
    %c0_i32_0 = arith.constant 0 : i32
    %c0_i32_1 = arith.constant 0 : i32
    return %c0_i32, %c0_i32_0 : i32, i32
  }
  func.func @transform_1(%arg0: i32) -> (i32, i32) {
    %c0_i32 = arith.constant 0 : i32
    %c0_i32_0 = arith.constant 0 : i32
    %c0_i32_1 = arith.constant 0 : i32
    return %c0_i32, %c0_i32_0 : i32, i32
  }
  func.func @transform_2(%arg0: i32) -> (i32, i32) {
    %c0_i32 = arith.constant 0 : i32
    %c0_i32_0 = arith.constant 0 : i32
    %c0_i32_1 = arith.constant 0 : i32
    return %c0_i32, %c0_i32_0 : i32, i32
  }
  func.func @transform_3(%arg0: i32) -> (i32, i32) {
    %c0_i32 = arith.constant 0 : i32
    %c0_i32_0 = arith.constant 0 : i32
    %c0_i32_1 = arith.constant 0 : i32
    return %c0_i32, %c0_i32_0 : i32, i32
  }
  func.func @transform_4(%arg0: i32) -> (i32, i32) {
    %c0_i32 = arith.constant 0 : i32
    %c0_i32_0 = arith.constant 0 : i32
    %c0_i32_1 = arith.constant 0 : i32
    return %c0_i32, %c0_i32_0 : i32, i32
  }
  func.func @transform_5(%arg0: i32) -> (i32, i32) {
    %c0_i32 = arith.constant 0 : i32
    %c0_i32_0 = arith.constant 0 : i32
    %c0_i32_1 = arith.constant 0 : i32
    return %c0_i32, %c0_i32_0 : i32, i32
  }
  func.func @transform_6(%arg0: i32) -> (i32, i32) {
    %c0_i32 = arith.constant 0 : i32
    %c0_i32_0 = arith.constant 0 : i32
    %c0_i32_1 = arith.constant 0 : i32
    return %c0_i32, %c0_i32_0 : i32, i32
  }
  func.func @transform_7(%arg0: i32) -> (i32, i32) {
    %c0_i32 = arith.constant 0 : i32
    %c0_i32_0 = arith.constant 0 : i32
    %c0_i32_1 = arith.constant 0 : i32
    return %c0_i32, %c0_i32_0 : i32, i32
  }
  func.func @transform_8(%arg0: i32) -> (i32, i32) {
    %c0_i32 = arith.constant 0 : i32
    %c0_i32_0 = arith.constant 0 : i32
    %c0_i32_1 = arith.constant 0 : i32
    return %c0_i32, %c0_i32_0 : i32, i32
  }
}

</mosaic_0001>

<bundles_post_ra>
// kernel: tpu_custom_call.1
= control target key start
LH: loop header
LB: loop body
LE: loop exit
PB: predicated region body
PF: predicated region fallthrough
CT: control target
= control target key end

     0   :  { %13 = vsyncpa [#allocation3], 0  ;;  %s1588_s0 = inlined_call_operand.hbm [shape: bf16[64,64], index: 0, kind: input, shape index: {}]   ;;  %s1589_s1 = inlined_call_operand.hbm [shape: bf16[64,128], index: 1, kind: input, shape index: {}]   ;;  %s1590_s2 = inlined_call_operand.hbm [shape: bf16[128,128], index: 2, kind: input, shape index: {}]   ;;  %s1591_s3 = inlined_call_operand.hbm [shape: bf16[128,128], index: 3, kind: input, shape index: {}]   ;;  %s1592_s4 = inlined_call_operand.vmem [shape: f32[1,128], index: 4, kind: input, shape index: {}]   ;;  %s1593_s5 = inlined_call_operand.hbm [shape: bf16[128,128], index: 5, kind: input, shape index: {}]   ;;  %s1594_s6 = inlined_call_operand.hbm [shape: bf16[128,128], index: 6, kind: input, shape index: {}]   ;;  %s1595_s7 = inlined_call_operand.vmem [shape: f32[1,128], index: 7, kind: input, shape index: {}]   ;;  %s1596_s8 = inlined_call_operand.hbm [shape: f32[64,128], index: 8, kind: output, shape index: {}]  }
   0x1   :  { %14 = vsyncpa [#allocation6], 0 }
   0x2   :  { %15 = vsyncpa [#allocation9], 0 }
   0x3   :  { %16 = vsyncpa [#allocation12], 0 }
   0x4   :  { %17 = vsyncpa [#allocation4], 0  ;;  %s1383_s27 = smov [#allocation5]   ;;  %s1384_s29 = smov [#allocation8]  }
   0x5   :  { %s35_s28 = sshll.u32 %s1383_s27, 4  ;;  %s59_s30 = sshll.u32 %s1384_s29, 4  ;;  %s36_s28 = int_to_ptr.vmem [resolvable:$true] %s35_s28  ;;  %s1439_s30 = int_to_ptr.vmem [resolvable:$true] %s59_s30 }
   0x6   :  { %s1219_s11 = scalar_lea.hbm %s1589_s1, 512 }
   0x7   :  { %p1220_p0 = scmp.ne.s32.totalorder %s1589_s1, %s1219_s11  ;;  %p1223_p1 = scmp.lt.u32.totalorder %s1219_s11, %s1589_s1 }
   0x9   :  { %p1225_p2 = pnand %p1223_p1, %p1220_p0 }
   0xb   :  { %1228 = shalt.err (!%p1225_p2)
}
   0xc   :  { %s1229_s16 = scalar_lea.vmem %s36_s28, 512  ;;  %p1234_p4 = scmp.lt.s32.totalorder %s36_s28, %s36_s28 }
   0xd   :  { %p1230_p3 = scmp.ne.s32.totalorder %s36_s28, %s1229_s16  ;;  %p1235_p5 = scmp.lt.s32.totalorder %s1229_s16, %s1229_s16 }
   0xf   :  { %p1236_p6 = por %p1235_p5, %p1234_p4 }
  0x11   :  { %p1237_p7 = pnand %p1236_p6, %p1230_p3 }
  0x13   :  { %1240 = shalt.err (!%p1237_p7)
}
  0x14   :  { %s1385_s17 = smov 64   ;;  %s1386_s18 = smov 4  }
  0x15   :  { %41 = dma.hbm_to_vmem [thread:$0]  %s1589_s1, 512, %s36_s28, [#allocation6], %s1385_s17, %s1385_s17, %s1386_s18  }
  0x16   :  { %s1241_s23 = scalar_lea.hbm %s1591_s3, 1024 }
  0x17   :  { %p1242_p8 = scmp.ne.s32.totalorder %s1591_s3, %s1241_s23  ;;  %p1245_p9 = scmp.lt.u32.totalorder %s1241_s23, %s1591_s3 }
  0x19   :  { %p1247_p10 = pnand %p1245_p9, %p1242_p8 }
  0x1b   :  { %1250 = shalt.err (!%p1247_p10)
}
  0x1c   :  { %s1251_s29 = scalar_lea.vmem %s1439_s30, 1024  ;;  %p1256_p12 = scmp.lt.s32.totalorder %s1439_s30, %s1439_s30 }
  0x1d   :  { %p1252_p11 = scmp.ne.s32.totalorder %s1439_s30, %s1251_s29  ;;  %p1257_p13 = scmp.lt.s32.totalorder %s1251_s29, %s1251_s29 }
  0x1f   :  { %p1258_p0 = por %p1257_p13, %p1256_p12 }
  0x21   :  { %p1259_p1 = pnand %p1258_p0, %p1252_p11 }
  0x23   :  { %1262 = shalt.err (!%p1259_p1)
}
  0x24   :  { %65 = dma.hbm_to_vmem [thread:$0]  %s1591_s3, 1024, %s1439_s30, [#allocation9], %s1385_s17, %s1385_s17, %s1386_s18  }
  0x25   :  { %s1387_s9 = smov [#allocation2]   ;;  %s1388_s11 = smov [#allocation7]  }
  0x26   :  { %s23_s10 = sshll.u32 %s1387_s9, 4  ;;  %s47_s12 = sshll.u32 %s1388_s11, 4  ;;  %s24_s10 = int_to_ptr.vmem [resolvable:$true] %s23_s10  ;;  %s1476_s12 = int_to_ptr.vmem [resolvable:$true] %s47_s12 }
  0x27   :  { %s1263_s15 = scalar_lea.hbm %s1588_s0, 512 }
  0x28   :  { %p1264_p2 = scmp.ne.s32.totalorder %s1588_s0, %s1263_s15  ;;  %p1267_p3 = scmp.lt.u32.totalorder %s1263_s15, %s1588_s0 }
  0x2a   :  { %p1269_p4 = pnand %p1267_p3, %p1264_p2 }
  0x2c   :  { %1272 = shalt.err (!%p1269_p4)
}
  0x2d   :  { %s1273_s3 = scalar_lea.vmem %s24_s10, 512  ;;  %p1278_p6 = scmp.lt.s32.totalorder %s24_s10, %s24_s10 }
  0x2e   :  { %p1274_p5 = scmp.ne.s32.totalorder %s24_s10, %s1273_s3  ;;  %p1279_p7 = scmp.lt.s32.totalorder %s1273_s3, %s1273_s3 }
  0x30   :  { %p1280_p8 = por %p1279_p7, %p1278_p6 }
  0x32   :  { %p1281_p9 = pnand %p1280_p8, %p1274_p5 }
  0x34   :  { %1284 = shalt.err (!%p1281_p9)
}
  0x35   :  { %29 = dma.hbm_to_vmem [thread:$0]  %s1588_s0, 512, %s24_s10, [#allocation3], %s1385_s17, %s1385_s17, %s1386_s18  }
  0x36   :  { %s1285_s25 = scalar_lea.hbm %s1590_s2, 1024 }
  0x37   :  { %p1286_p10 = scmp.ne.s32.totalorder %s1590_s2, %s1285_s25  ;;  %p1289_p11 = scmp.lt.u32.totalorder %s1285_s25, %s1590_s2 }
  0x39   :  { %p1291_p12 = pnand %p1289_p11, %p1286_p10 }
  0x3b   :  { %1294 = shalt.err (!%p1291_p12)
}
  0x3c   :  { %s1295_s28 = scalar_lea.vmem %s1476_s12, 1024  ;;  %p1300_p0 = scmp.lt.s32.totalorder %s1476_s12, %s1476_s12 }
  0x3d   :  { %p1296_p13 = scmp.ne.s32.totalorder %s1476_s12, %s1295_s28  ;;  %p1301_p1 = scmp.lt.s32.totalorder %s1295_s28, %s1295_s28 }
  0x3f   :  { %p1302_p2 = por %p1301_p1, %p1300_p0 }
  0x41   :  { %p1303_p3 = pnand %p1302_p2, %p1296_p13 }
  0x43   :  { %1306 = shalt.err (!%p1303_p3)
}
  0x44   :  { %53 = dma.hbm_to_vmem [thread:$0]  %s1590_s2, 1024, %s1476_s12, [#allocation6], %s1385_s17, %s1385_s17, %s1386_s18  }
  0x45   :  { %s1389_s10 = smov [#allocation10]   ;;  %s1390_s13 = smov [#allocation11]  }
  0x46   :  { %s73_s11 = sshll.u32 %s1389_s10, 4  ;;  %s85_s14 = sshll.u32 %s1390_s13, 4  ;;  %s74_s11 = int_to_ptr.vmem [resolvable:$true] %s73_s11  ;;  %s1513_s14 = int_to_ptr.vmem [resolvable:$true] %s85_s14 }
  0x47   :  { %s1307_s19 = scalar_lea.hbm %s1593_s5, 1024 }
  0x48   :  { %p1308_p4 = scmp.ne.s32.totalorder %s1593_s5, %s1307_s19  ;;  %p1311_p5 = scmp.lt.u32.totalorder %s1307_s19, %s1593_s5 }
  0x4a   :  { %p1313_p6 = pnand %p1311_p5, %p1308_p4 }
  0x4c   :  { %1316 = shalt.err (!%p1313_p6)
}
  0x4d   :  { %s1317_s2 = scalar_lea.vmem %s74_s11, 1024  ;;  %p1322_p8 = scmp.lt.s32.totalorder %s74_s11, %s74_s11 }
  0x4e   :  { %p1318_p7 = scmp.ne.s32.totalorder %s74_s11, %s1317_s2  ;;  %p1323_p9 = scmp.lt.s32.totalorder %s1317_s2, %s1317_s2 }
  0x50   :  { %p1324_p10 = por %p1323_p9, %p1322_p8 }
  0x52   :  { %p1325_p11 = pnand %p1324_p10, %p1318_p7 }
  0x54   :  { %1328 = shalt.err (!%p1325_p11)
}
  0x55   :  { %79 = dma.hbm_to_vmem [thread:$0]  %s1593_s5, 1024, %s74_s11, [#allocation9], %s1385_s17, %s1385_s17, %s1386_s18  }
  0x56   :  { %s1329_s25 = scalar_lea.hbm %s1594_s6, 1024 }
  0x57   :  { %p1330_p12 = scmp.ne.s32.totalorder %s1594_s6, %s1329_s25  ;;  %p1333_p13 = scmp.lt.u32.totalorder %s1329_s25, %s1594_s6 }
  0x59   :  { %p1335_p0 = pnand %p1333_p13, %p1330_p12 }
  0x5b   :  { %1338 = shalt.err (!%p1335_p0)
}
  0x5c   :  { %s1339_s28 = scalar_lea.vmem %s1513_s14, 1024  ;;  %p1344_p2 = scmp.lt.s32.totalorder %s1513_s14, %s1513_s14 }
  0x5d   :  { %p1340_p1 = scmp.ne.s32.totalorder %s1513_s14, %s1339_s28  ;;  %p1345_p3 = scmp.lt.s32.totalorder %s1339_s28, %s1339_s28 }
  0x5f   :  { %p1346_p4 = por %p1345_p3, %p1344_p2 }
  0x61   :  { %p1347_p5 = pnand %p1346_p4, %p1340_p1 }
  0x63   :  { %1350 = shalt.err (!%p1347_p5)
}
  0x64   :  { %91 = dma.hbm_to_vmem [thread:$0]  %s1594_s6, 1024, %s1513_s14, [#allocation12], %s1385_s17, %s1385_s17, %s1386_s18  }
  0x65   :  { %1373 = dma.done.wait [#allocation3], 512  }
  0x66   :  { %1374 = vsyncadd [#allocation3], 4294966784 }
  0x67   :  { %1375 = dma.done.wait [#allocation6], 1536  }
  0x68   :  { %1376 = vsyncadd [#allocation6], 4294965760 }
  0x69   :  { %1377 = dma.done.wait [#allocation9], 2048  }
  0x6a   :  { %1378 = vsyncadd [#allocation9], 4294965248 }
  0x6b   :  { %1379 = dma.done.wait [#allocation12], 1024  }
  0x6c   :  { %1380 = vsyncadd [#allocation12], 4294966272  ;;  %v1179_v0 = vld [vmem:[#allocation5] sm:$0xff]   ;;  %v1180_v1 = vld [vmem:[#allocation5 + $0x8] sm:$0xff]   ;;  %vm173_vm0 = vcmask 523264   ;;  %s1391_s9 = smov [#allocation13]  }
  0x6d   :  { %1024 = vmatprep.subr.bf16.mxu1 %v1179_v0  ;;  %v1181_v2 = vld [vmem:[#allocation5 + $0x10] sm:$0xff]   ;;  %v1183_v3 = vld [vmem:[#allocation2] sm:$0xff]   ;;  %v1182_v4 = vld [vmem:[#allocation5 + $0x18] sm:$0xff]   ;;  %s895_s10 = sshll.u32 %s1391_s9, 4  ;;  %s896_s10 = int_to_ptr.vmem [resolvable:$true] %s895_s10 }
  0x6e   :  { %1025 = vmatpush3.bf16.msra.mxu1 %v1179_v0  ;;  %1032 = vmatprep.mubr.msk.bf16.mxu1 %vm173_vm0, %v1183_v3  ;;  %v1187_v5 = vld [vmem:[#allocation8] sm:$0xff]   ;;  %v1552_v6 = vld [vmem:[#allocation2 + $0x8] sm:$0xff]   ;;  %v1554_v7 = vld [vmem:[#allocation2 + $0x10] sm:$0xff]   ;;  %p1356_p7 = scmp.lt.s32.totalorder %s896_s10, %s896_s10 }
  0x6f   :  { %1026 = vmatprep.subr.bf16.mxu1 %v1180_v1  ;;  %1096 = vmatprep.mubr.msk.bf16.mxu0 %vm173_vm0, %v1183_v3  ;;  %v1188_v8 = vld [vmem:[#allocation8 + $0x8] sm:$0xff]   ;;  %v1189_v9 = vld [vmem:[#allocation8 + $0x10] sm:$0xff]   ;;  %v1560_v10 = vld [vmem:[#allocation2 + $0x18] sm:$0xff]  }
  0x70   :  { %v1190_v11 = vld [vmem:[#allocation8 + $0x18] sm:$0xff]   ;;  %v1191_v12 = vld [vmem:[#allocation8 + $0x20] sm:$0xff]   ;;  %v1192_v13 = vld [vmem:[#allocation8 + $0x28] sm:$0xff]  }
  0x71   :  { %v1193_v14 = vld [vmem:[#allocation8 + $0x30] sm:$0xff]   ;;  %v1194_v15 = vld [vmem:[#allocation8 + $0x38] sm:$0xff]   ;;  %v1195_v16 = vld [vmem:[#allocation7] sm:$0xff]  }
  0x72   :  { %1027 = vmatpush3.bf16.msra.mxu1 %v1180_v1  ;;  %v1196_v17 = vld [vmem:[#allocation7 + $0x8] sm:$0xff]   ;;  %v1197_v18 = vld [vmem:[#allocation7 + $0x10] sm:$0xff]   ;;  %v1198_v19 = vld [vmem:[#allocation7 + $0x18] sm:$0xff]  }
  0x73   :  { %1028 = vmatprep.subr.bf16.mxu1 %v1181_v2  ;;  %v1199_v20 = vld [vmem:[#allocation7 + $0x20] sm:$0xff]   ;;  %v1200_v21 = vld [vmem:[#allocation7 + $0x28] sm:$0xff]   ;;  %v1201_v22 = vld [vmem:[#allocation7 + $0x30] sm:$0xff]  }
  0x74   :  { %v1202_v23 = vld [vmem:[#allocation7 + $0x38] sm:$0xff]   ;;  %v938_v36 = vld [vmem:[%s1592_s4] ss:$0 sm:$0xff]  ;;  %v1205_v3 = vld [vmem:[#allocation11 + $0x10] sm:$0xff]  }
  0x76   :  { %1029 = vmatpush3.bf16.msra.mxu1 %v1181_v2 }
  0x77   :  { %1030 = vmatprep.subr.bf16.mxu1 %v1182_v4 }
  0x7a   :  { %1031 = vmatpush3.bf16.msra.mxu1 %v1182_v4 }
  0x7b   :  { %1040 = vmatprep.subr.bf16.mxu1 %v1187_v5 }
  0x7d   :  { %1033 = vmatmul.mubr.msk.bf16.vlgmr.msra.gmra.mrb[0].mxu1 %vm173_vm0, %v1552_v6 }
  0x7e   :  { %1036 = vmatprep.mubr.msk.bf16.mxu1 %vm173_vm0, %v1554_v7  ;;  %1041 = vmatpush3.bf16.msra.mxu1 %v1187_v5  ;;  %v1207_v5 = vld [vmem:[#allocation11 + $0x20] sm:$0xff]  }
  0x7f   :  { %1042 = vmatprep.subr.bf16.mxu1 %v1188_v8 }
  0x82   :  { %1043 = vmatpush3.bf16.msra.mxu1 %v1188_v8  ;;  %v1208_v8 = vld [vmem:[#allocation11 + $0x28] sm:$0xff]  }
  0x83   :  { %1044 = vmatprep.subr.bf16.mxu1 %v1189_v9 }
  0x85   :  { %1037 = vmatmul.mubr.msk.bf16.gmra.mrb[4].mxu1 %vm173_vm0, %v1560_v10 }
  0x86   :  { %1045 = vmatpush3.bf16.msra.mxu1 %v1189_v9  ;;  %1056 = vmatprep.mubr.bf16.mxu1 %v1179_v0  ;;  %v1211_v9 = vld [vmem:[#allocation10] sm:$0xff]  }
  0x87   :  { %1046 = vmatprep.subr.bf16.mxu1 %v1190_v11 }
  0x8a   :  { %1047 = vmatpush3.bf16.msra.mxu1 %v1190_v11  ;;  %v1212_v11 = vld [vmem:[#allocation10 + $0x8] sm:$0xff]  }
  0x8b   :  { %1048 = vmatprep.subr.bf16.mxu1 %v1191_v12 }
  0x8e   :  { %1049 = vmatpush3.bf16.msra.mxu1 %v1191_v12  ;;  %v1214_v12 = vld [vmem:[#allocation10 + $0x18] sm:$0xff]  }
  0x8f   :  { %1050 = vmatprep.subr.bf16.mxu1 %v1192_v13 }
  0x92   :  { %1051 = vmatpush3.bf16.msra.mxu1 %v1192_v13  ;;  %v1215_v13 = vld [vmem:[#allocation10 + $0x20] sm:$0xff]  }
  0x93   :  { %1052 = vmatprep.subr.bf16.mxu1 %v1193_v14 }
  0x96   :  { %1053 = vmatpush3.bf16.msra.mxu1 %v1193_v14  ;;  %v1216_v14 = vld [vmem:[#allocation10 + $0x28] sm:$0xff]  }
  0x97   :  { %1054 = vmatprep.subr.bf16.mxu1 %v1194_v15 }
  0x9a   :  { %1055 = vmatpush3.bf16.msra.mxu1 %v1194_v15  ;;  %v1217_v15 = vld [vmem:[#allocation10 + $0x30] sm:$0xff]  }
  0x9b   :  { %1064 = vmatprep.subr.bf16.mxu1 %v1195_v16 }
  0x9d   :  { %1057 = vmatmul.mubr.bf16.vlgmr.msra.gmra.mrb[8].mxu1 %v1180_v1  ;;  %v1203_v1 = vld [vmem:[#allocation11] sm:$0xff]  }
  0x9e   :  { %1065 = vmatpush3.bf16.msra.mxu1 %v1195_v16  ;;  %1060 = vmatprep.mubr.bf16.mxu1 %v1181_v2  ;;  %v1204_v2 = vld [vmem:[#allocation11 + $0x8] sm:$0xff]   ;;  %v1218_v16 = vld [vmem:[#allocation10 + $0x38] sm:$0xff]  }
  0x9f   :  { %1066 = vmatprep.subr.bf16.mxu1 %v1196_v17 }
  0xa2   :  { %1067 = vmatpush3.bf16.msra.mxu1 %v1196_v17 }
  0xa3   :  { %1068 = vmatprep.subr.bf16.mxu1 %v1197_v18 }
  0xa5   :  { %1061 = vmatmul.mubr.bf16.gmra.mrb[12].mxu1 %v1182_v4  ;;  %v1206_v4 = vld [vmem:[#allocation11 + $0x18] sm:$0xff]  }
  0xa6   :  { %1069 = vmatpush3.bf16.msra.mxu1 %v1197_v18 }
  0xa7   :  { %1070 = vmatprep.subr.bf16.mxu1 %v1198_v19 }
  0xaa   :  { %1071 = vmatpush3.bf16.msra.mxu1 %v1198_v19 }
  0xab   :  { %1072 = vmatprep.subr.bf16.mxu1 %v1199_v20 }
  0xae   :  { %1073 = vmatpush3.bf16.msra.mxu1 %v1199_v20 }
  0xaf   :  { %1074 = vmatprep.subr.bf16.mxu1 %v1200_v21 }
  0xb2   :  { %1075 = vmatpush3.bf16.msra.mxu1 %v1200_v21 }
  0xb3   :  { %1076 = vmatprep.subr.bf16.mxu1 %v1201_v22 }
  0xb6   :  { %1077 = vmatpush3.bf16.msra.mxu1 %v1201_v22 }
  0xb7   :  { %1078 = vmatprep.subr.bf16.mxu1 %v1202_v23 }
  0xba   :  { %1079 = vmatpush3.bf16.msra.mxu1 %v1202_v23 }
 0x150   :  { %v1034_v24 = vpop.f32.mrb[0].mxu1 }
 0x151   :  { %v220_v25 = vpop.f32.mrb[1].mxu1 }
 0x152   :  { %v1035_v26 = vpop.f32.mrb[2].mxu1 }
 0x153   :  { %v252_v27 = vpack.c.bf16 %v1035_v26, %v1034_v24  ;;  %v223_v28 = vpop.f32.mrb[3].mxu1 }
 0x154   :  { %v251_v29 = vpack.c.bf16 %v223_v28, %v220_v25 }
 0x156   :  { %1080 = vmatprep.mubr.bf16.mxu1 %v251_v29  ;;  %v959_v29 = vld [vmem:[%s1595_s7] ss:$0 sm:$0xff]  ;;  %s1351_s7 = scalar_lea.vmem %s896_s10, 1024 }
 0x157   :  { %1081 = vmatmul.mubr.bf16.vlgmr.msra.gmra.mrb[8].mxu1 %v252_v27  ;;  %p1352_p6 = scmp.ne.s32.totalorder %s896_s10, %s1351_s7  ;;  %p1357_p8 = scmp.lt.s32.totalorder %s1351_s7, %s1351_s7 }
 0x158   :  { %v1038_v30 = vpop.f32.mrb[4].mxu1 }
 0x159   :  { %v236_v31 = vpop.f32.mrb[5].mxu1  ;;  %p1358_p9 = por %p1357_p8, %p1356_p7 }
 0x15a   :  { %v1039_v32 = vpop.f32.mrb[6].mxu1 }
 0x15b   :  { %v254_v33 = vpack.c.bf16 %v1039_v32, %v1038_v30  ;;  %v239_v34 = vpop.f32.mrb[7].mxu1  ;;  %p1359_p10 = pnand %p1358_p9, %p1352_p6 }
 0x15c   :  { %v253_v35 = vpack.c.bf16 %v239_v34, %v236_v31 }
 0x15e   :  { %1084 = vmatprep.mubr.bf16.mxu1 %v253_v35 }
 0x15f   :  { %1085 = vmatmul.mubr.bf16.gmra.mrb[12].mxu1 %v254_v33 }
 0x22a   :  { %v1082_v37 = vpop.f32.mrb[8].mxu1 }
 0x22b   :  { %v522_v38 = vadd.f32 %v1082_v37, %v938_v36  ;;  %v482_v39 = vpop.f32.mrb[9].mxu1 }
 0x22c   :  { %v520_v40 = vadd.f32 %v938_v36, %v482_v39  ;;  %v1083_v41 = vpop.f32.mrb[10].mxu1 }
 0x22d   :  { %v523_v42 = vadd.f32 %v1083_v41, %v938_v36  ;;  %v485_v43 = vpop.f32.mrb[11].mxu1  ;;  %v530_v45 = vmax.f32 %v522_v38, 0.0 }
 0x22e   :  { %v521_v44 = vadd.f32 %v938_v36, %v485_v43  ;;  %v528_v47 = vmax.f32 %v520_v40, 0.0 }
 0x22f   :  { %v531_v46 = vmax.f32 %v523_v42, 0.0 }
 0x230   :  { %v529_v48 = vmax.f32 %v521_v44, 0.0 }
 0x231   :  { %v537_v49 = vpack.c.bf16 %v531_v46, %v530_v45 }
 0x232   :  { %v536_v50 = vpack.c.bf16 %v529_v48, %v528_v47  ;;  %v1086_v51 = vpop.f32.mrb[12].mxu1 }
 0x233   :  { %v526_v52 = vadd.f32 %v1086_v51, %v938_v36  ;;  %v498_v53 = vpop.f32.mrb[13].mxu1 }
 0x234   :  { %v524_v54 = vadd.f32 %v938_v36, %v498_v53  ;;  %v1087_v55 = vpop.f32.mrb[14].mxu1  ;;  %1088 = vmatprep.subr.bf16.mxu0 %v536_v50 }
 0x235   :  { %v527_v56 = vadd.f32 %v1087_v55, %v938_v36  ;;  %v501_v57 = vpop.f32.mrb[15].mxu1  ;;  %1089 = vmatpush3.bf16.msra.mxu0 %v536_v50  ;;  %v534_v59 = vmax.f32 %v526_v52, 0.0 }
 0x236   :  { %v525_v58 = vadd.f32 %v938_v36, %v501_v57  ;;  %1090 = vmatprep.subr.bf16.mxu0 %v537_v49  ;;  %v532_v61 = vmax.f32 %v524_v54, 0.0 }
 0x237   :  { %v535_v60 = vmax.f32 %v527_v56, 0.0 }
 0x238   :  { %v533_v62 = vmax.f32 %v525_v58, 0.0 }
 0x239   :  { %v539_v63 = vpack.c.bf16 %v535_v60, %v534_v59  ;;  %1091 = vmatpush3.bf16.msra.mxu0 %v537_v49 }
 0x23a   :  { %v538_v0 = vpack.c.bf16 %v533_v62, %v532_v61 }
 0x23c   :  { %1092 = vmatprep.subr.bf16.mxu0 %v538_v0 }
 0x23d   :  { %1093 = vmatpush3.bf16.msra.mxu0 %v538_v0 }
 0x23e   :  { %1094 = vmatprep.subr.bf16.mxu0 %v539_v63 }
 0x241   :  { %1095 = vmatpush3.bf16.msra.mxu0 %v539_v63 }
 0x242   :  { %1104 = vmatprep.subr.bf16.mxu0 %v1203_v1 }
 0x244   :  { %1097 = vmatmul.mubr.msk.bf16.vlgmr.msra.gmra.mrb[0].mxu0 %vm173_vm0, %v1552_v6  ;;  %v1209_v6 = vld [vmem:[#allocation11 + $0x30] sm:$0xff]  }
 0x245   :  { %1105 = vmatpush3.bf16.msra.mxu0 %v1203_v1  ;;  %1100 = vmatprep.mubr.msk.bf16.mxu0 %vm173_vm0, %v1554_v7  ;;  %v1210_v7 = vld [vmem:[#allocation11 + $0x38] sm:$0xff]  }
 0x246   :  { %1106 = vmatprep.subr.bf16.mxu0 %v1204_v2 }
 0x249   :  { %1107 = vmatpush3.bf16.msra.mxu0 %v1204_v2 }
 0x24a   :  { %1108 = vmatprep.subr.bf16.mxu0 %v1205_v3 }
 0x24c   :  { %1101 = vmatmul.mubr.msk.bf16.gmra.mrb[4].mxu0 %vm173_vm0, %v1560_v10  ;;  %v1213_v10 = vld [vmem:[#allocation10 + $0x10] sm:$0xff]  }
 0x24d   :  { %1109 = vmatpush3.bf16.msra.mxu0 %v1205_v3  ;;  %1120 = vmatprep.mubr.bf16.mxu0 %v536_v50 }
 0x24e   :  { %1110 = vmatprep.subr.bf16.mxu0 %v1206_v4 }
 0x251   :  { %1111 = vmatpush3.bf16.msra.mxu0 %v1206_v4 }
 0x252   :  { %1112 = vmatprep.subr.bf16.mxu0 %v1207_v5 }
 0x255   :  { %1113 = vmatpush3.bf16.msra.mxu0 %v1207_v5 }
 0x256   :  { %1114 = vmatprep.subr.bf16.mxu0 %v1208_v8 }
 0x259   :  { %1115 = vmatpush3.bf16.msra.mxu0 %v1208_v8 }
 0x25a   :  { %1116 = vmatprep.subr.bf16.mxu0 %v1209_v6 }
 0x25d   :  { %1117 = vmatpush3.bf16.msra.mxu0 %v1209_v6 }
 0x25e   :  { %1118 = vmatprep.subr.bf16.mxu0 %v1210_v7 }
 0x261   :  { %1119 = vmatpush3.bf16.msra.mxu0 %v1210_v7 }
 0x262   :  { %1128 = vmatprep.subr.bf16.mxu0 %v1211_v9 }
 0x264   :  { %1121 = vmatmul.mubr.bf16.vlgmr.msra.gmra.mrb[8].mxu0 %v537_v49 }
 0x265   :  { %1124 = vmatprep.mubr.bf16.mxu0 %v538_v0  ;;  %1129 = vmatpush3.bf16.msra.mxu0 %v1211_v9 }
 0x266   :  { %1130 = vmatprep.subr.bf16.mxu0 %v1212_v11 }
 0x269   :  { %1131 = vmatpush3.bf16.msra.mxu0 %v1212_v11 }
 0x26a   :  { %1132 = vmatprep.subr.bf16.mxu0 %v1213_v10 }
 0x26c   :  { %1125 = vmatmul.mubr.bf16.gmra.mrb[12].mxu0 %v539_v63 }
 0x26d   :  { %1133 = vmatpush3.bf16.msra.mxu0 %v1213_v10 }
 0x26e   :  { %1134 = vmatprep.subr.bf16.mxu0 %v1214_v12 }
 0x271   :  { %1135 = vmatpush3.bf16.msra.mxu0 %v1214_v12 }
 0x272   :  { %1136 = vmatprep.subr.bf16.mxu0 %v1215_v13 }
 0x275   :  { %1137 = vmatpush3.bf16.msra.mxu0 %v1215_v13 }
 0x276   :  { %1138 = vmatprep.subr.bf16.mxu0 %v1216_v14 }
 0x279   :  { %1139 = vmatpush3.bf16.msra.mxu0 %v1216_v14 }
 0x27a   :  { %1140 = vmatprep.subr.bf16.mxu0 %v1217_v15 }
 0x27d   :  { %1141 = vmatpush3.bf16.msra.mxu0 %v1217_v15 }
 0x27e   :  { %1142 = vmatprep.subr.bf16.mxu0 %v1218_v16 }
 0x281   :  { %1143 = vmatpush3.bf16.msra.mxu0 %v1218_v16 }
 0x317   :  { %v1098_v17 = vpop.f32.mrb[0].mxu0 }
 0x318   :  { %v574_v18 = vpop.f32.mrb[1].mxu0 }
 0x319   :  { %v1099_v19 = vpop.f32.mrb[2].mxu0 }
 0x31a   :  { %v606_v20 = vpack.c.bf16 %v1099_v19, %v1098_v17  ;;  %v577_v21 = vpop.f32.mrb[3].mxu0 }
 0x31b   :  { %v605_v22 = vpack.c.bf16 %v577_v21, %v574_v18 }
 0x31d   :  { %1144 = vmatprep.mubr.bf16.mxu0 %v605_v22 }
 0x31e   :  { %1145 = vmatmul.mubr.bf16.vlgmr.msra.gmra.mrb[8].mxu0 %v606_v20 }
 0x31f   :  { %v1102_v23 = vpop.f32.mrb[4].mxu0 }
 0x320   :  { %v590_v24 = vpop.f32.mrb[5].mxu0 }
 0x321   :  { %v1103_v25 = vpop.f32.mrb[6].mxu0 }
 0x322   :  { %v608_v26 = vpack.c.bf16 %v1103_v25, %v1102_v23  ;;  %v593_v27 = vpop.f32.mrb[7].mxu0 }
 0x323   :  { %v607_v28 = vpack.c.bf16 %v593_v27, %v590_v24 }
 0x325   :  { %1148 = vmatprep.mubr.bf16.mxu0 %v607_v28 }
 0x326   :  { %1149 = vmatmul.mubr.bf16.gmra.mrb[12].mxu0 %v608_v26 }
 0x3f1   :  { %v1146_v30 = vpop.f32.mrb[8].mxu0 }
 0x3f2   :  { %v876_v31 = vadd.f32 %v1146_v30, %v959_v29  ;;  %v836_v32 = vpop.f32.mrb[9].mxu0 }
 0x3f3   :  { %v874_v33 = vadd.f32 %v959_v29, %v836_v32  ;;  %v1147_v34 = vpop.f32.mrb[10].mxu0 }
 0x3f4   :  { %884 = vst [vmem:[#allocation13 + $0x10] sm:$0xff] %v876_v31  ;;  %v877_v35 = vadd.f32 %v1147_v34, %v959_v29  ;;  %v839_v36 = vpop.f32.mrb[11].mxu0 }
 0x3f5   :  { %882 = vst [vmem:[#allocation13] sm:$0xff] %v874_v33  ;;  %v875_v37 = vadd.f32 %v959_v29, %v839_v36 }
 0x3f6   :  { %885 = vst [vmem:[#allocation13 + $0x18] sm:$0xff] %v877_v35 }
 0x3f7   :  { %883 = vst [vmem:[#allocation13 + $0x8] sm:$0xff] %v875_v37 }
 0x3f9   :  { %v1150_v38 = vpop.f32.mrb[12].mxu0 }
 0x3fa   :  { %v880_v39 = vadd.f32 %v1150_v38, %v959_v29  ;;  %v852_v40 = vpop.f32.mrb[13].mxu0 }
 0x3fb   :  { %v878_v41 = vadd.f32 %v959_v29, %v852_v40  ;;  %v1151_v42 = vpop.f32.mrb[14].mxu0 }
 0x3fc   :  { %888 = vst [vmem:[#allocation13 + $0x30] sm:$0xff] %v880_v39  ;;  %v881_v43 = vadd.f32 %v1151_v42, %v959_v29  ;;  %v855_v44 = vpop.f32.mrb[15].mxu0 }
 0x3fd   :  { %886 = vst [vmem:[#allocation13 + $0x20] sm:$0xff] %v878_v41  ;;  %v879_v45 = vadd.f32 %v959_v29, %v855_v44 }
 0x3fe   :  { %889 = vst [vmem:[#allocation13 + $0x38] sm:$0xff] %v881_v43 }
 0x3ff   :  { %887 = vst [vmem:[#allocation13 + $0x28] sm:$0xff] %v879_v45 }
 0x400   :  { %1362 = shalt.err (!%p1359_p10)
}
 0x401   :  { %s1363_s14 = scalar_lea.hbm %s1596_s8, 1024 }
 0x402   :  { %p1364_p11 = scmp.ne.s32.totalorder %s1596_s8, %s1363_s14  ;;  %p1367_p12 = scmp.lt.u32.totalorder %s1363_s14, %s1596_s8 }
 0x404   :  { %p1369_p13 = pnand %p1367_p12, %p1364_p11 }
 0x406   :  { %1372 = shalt.err (!%p1369_p13)
}
 0x407   :  { %s1392_s21 = smov 128   ;;  %s1393_s3 = smov 8  }
 0x408   :  { %901 = dma.vmem_to_hbm [thread:$0]  %s896_s10, 1024, %s1596_s8, [#allocation4], %s1392_s21, %s1392_s21, %s1393_s3  }
 0x409   :  { %1381 = dma.done.wait [#allocation4], 1024  }
 0x40a   :  { %1382 = vsyncadd [#allocation4], 4294966272 }
 0x40b   :  { %905 = vsyncpa [#allocation3], 1 }
 0x40c   :  { %906 = vsyncpa [#allocation6], 1 }
 0x40d   :  { %907 = vsyncpa [#allocation9], 1 }
 0x40e   :  { %908 = vsyncpa [#allocation12], 1 }
 0x40f   :  { %909 = vsyncpa [#allocation4], 1 }

</bundles_post_ra>
